<compile_context>
chip_gen: v6e
topology: v6e:2x2x1
jax: 0.10.0
libtpu: 0.0.40
codegen_flags: <defaults>
</compile_context>

<pallas_src>
import functools

import jax
import jax.numpy as jnp
from jax.experimental import pallas as pl
from jax.experimental.pallas import tpu as pltpu


# ----------------------------------------------------------------------------
# Pallas kernels
# ----------------------------------------------------------------------------
def _block_kernel_proj(x_ref,
                       wcat_ref, bcat_ref,
                       w2_ref, b2_ref,
                       w3_ref, b3_ref,
                       o_ref, *, mid_p):
    """BasicBlock with 1x1-conv projection shortcut (in_features != out_features).

    conv1 and the shortcut conv are fused into a single matmul over x; the
    result is split at a lane-tile boundary (mid_p is a multiple of 128).
    """
    x = x_ref[...]
    t = jnp.dot(x, wcat_ref[...], preferred_element_type=jnp.float32) + bcat_ref[...]
    h = jnp.maximum(t[:, :mid_p], 0.0)          # conv1 + BN + ReLU
    sc = t[:, mid_p:]                           # shortcut conv + BN (no ReLU)

    h = jnp.dot(h.astype(w2_ref.dtype), w2_ref[...],
                preferred_element_type=jnp.float32) + b2_ref[...]
    h = jnp.maximum(h, 0.0)                     # conv2 + BN + ReLU

    y = jnp.dot(h.astype(w3_ref.dtype), w3_ref[...],
                preferred_element_type=jnp.float32) + b3_ref[...]  # conv3 + BN

    o_ref[...] = jnp.maximum(y + sc, 0.0)       # residual add + ReLU


def _block_kernel_identity(x_ref,
                           w1_ref, b1_ref,
                           w2_ref, b2_ref,
                           w3_ref, b3_ref,
                           o_ref):
    """BasicBlock with identity shortcut (in_features == out_features)."""
    x = x_ref[...]
    h = jnp.maximum(jnp.dot(x, w1_ref[...],
                            preferred_element_type=jnp.float32) + b1_ref[...], 0.0)
    h = jnp.maximum(jnp.dot(h.astype(w2_ref.dtype), w2_ref[...],
                            preferred_element_type=jnp.float32) + b2_ref[...], 0.0)
    y = jnp.dot(h.astype(w3_ref.dtype), w3_ref[...],
                preferred_element_type=jnp.float32) + b3_ref[...]
    o_ref[...] = jnp.maximum(y + x.astype(jnp.float32), 0.0)


# ----------------------------------------------------------------------------
# Parameter setup (deterministic, synthetic) + host-side preparation
# ----------------------------------------------------------------------------
def _bn_fold(gamma, beta, mean, var, eps=1e-5):
    """Fold inference-mode BatchNorm into a per-channel scale/bias."""
    scale = gamma * jax.lax.rsqrt(var + eps)
    bias = beta - mean * scale
    return scale.reshape(1, -1), bias.reshape(1, -1)


def make_params(key, in_features, mid_features, out_features):
    """Deterministic synthetic parameters matching the PyTorch module's shapes.

    Conv weights are stored as (C_in, C_out) matmul matrices (the PyTorch
    (C_out, C_in, 1, 1) conv weight, transposed).
    """
    ks = jax.random.split(key, 16)

    def w(k, cin, cout):
        return jax.random.normal(k, (cin, cout), jnp.float32) * 0.1

    def bn(k, c):
        k1, k2, k3, k4 = jax.random.split(k, 4)
        gamma = 1.0 + 0.1 * jax.random.normal(k1, (c,), jnp.float32)
        beta = 0.1 * jax.random.normal(k2, (c,), jnp.float32)
        mean = 0.1 * jax.random.normal(k3, (c,), jnp.float32)
        var = 1.0 + 0.1 * jnp.abs(jax.random.normal(k4, (c,), jnp.float32))
        return _bn_fold(gamma, beta, mean, var)

    params = {
        "w1": w(ks[0], in_features, mid_features),
        "w2": w(ks[1], mid_features, mid_features),
        "w3": w(ks[2], mid_features, out_features),
    }
    params["s1"], params["b1"] = bn(ks[3], mid_features)
    params["s2"], params["b2"] = bn(ks[4], mid_features)
    params["s3"], params["b3"] = bn(ks[5], out_features)
    if in_features != out_features:
        params["ws"] = w(ks[6], in_features, out_features)
        params["ss"], params["bs"] = bn(ks[7], out_features)
    return params


def _round_up(x, m):
    return (x + m - 1) // m * m


def prepare_params(params, in_features, mid_features, out_features,
                   compute_dtype=jnp.bfloat16):
    """Host-side prep: fold BN scale into weights, pad channels to multiples of
    128, fuse conv1+shortcut weights, cast weights to the compute dtype."""
    cin_p = _round_up(in_features, 128)
    cmid_p = _round_up(mid_features, 128)
    cout_p = _round_up(out_features, 128)

    def pad2(a, r, c):
        return jnp.pad(a, ((0, r - a.shape[0]), (0, c - a.shape[1])))

    # Fold BN scale into weights (per output column); biases stay f32.
    w1 = pad2(params["w1"] * params["s1"], cin_p, cmid_p).astype(compute_dtype)
    w2 = pad2(params["w2"] * params["s2"], cmid_p, cmid_p).astype(compute_dtype)
    w3 = pad2(params["w3"] * params["s3"], cmid_p, cout_p).astype(compute_dtype)
    b1 = pad2(params["b1"], 1, cmid_p)
    b2 = pad2(params["b2"], 1, cmid_p)
    b3 = pad2(params["b3"], 1, cout_p)

    prepared = {"w2": w2, "b2": b2, "w3": w3, "b3": b3,
                "cin_p": cin_p, "cmid_p": cmid_p, "cout_p": cout_p}

    if "ws" in params:
        ws = pad2(params["ws"] * params["ss"], cin_p, cout_p).astype(compute_dtype)
        bs = pad2(params["bs"], 1, cout_p)
        prepared["wcat"] = jnp.concatenate([w1, ws], axis=1)   # (cin_p, cmid_p+cout_p)
        prepared["bcat"] = jnp.concatenate([b1, bs], axis=1)
    else:
        prepared["w1"] = w1
        prepared["b1"] = b1
    return prepared


# ----------------------------------------------------------------------------
# Tile selection (VMEM-budget aware; conservative enough for v7x)
# ----------------------------------------------------------------------------
def _choose_tm(rows, cin_p, cmid_p, cout_p, compute_bytes=2):
    budget = 24 * 1024 * 1024  # conservative: fits v7x's smaller scoped VMEM
    # Weight/bias operands (constant index_map, double-buffered by default).
    weight_bytes = 2 * compute_bytes * (cin_p * (cmid_p + cout_p)
                                        + cmid_p * cmid_p + cmid_p * cout_p)
    bias_bytes = 2 * 4 * (2 * cmid_p + 2 * cout_p)
    avail = max(budget - weight_bytes - bias_bytes, 1 << 20)
    # Per-row footprint: x block (bf16, 2 buffers) + out block (f32, 2 buffers)
    # + f32 intermediates inside the body.
    per_row = (2 * compute_bytes * cin_p + 2 * 4 * cout_p
               + 4 * (cmid_p + cout_p) + 4 * cmid_p + compute_bytes * cmid_p)
    tm = max(8, min(512, int(avail // per_row) // 8 * 8))
    if rows < 2 * tm:
        # Guarantee >= 2 grid steps whenever possible (v7x has 2 TensorCores).
        half = _round_up(max(1, (rows + 1) // 2), 8)
        tm = max(8, min(tm, half))
    return tm


# ----------------------------------------------------------------------------
# Wrapper: NCHW in / NCHW out
# ----------------------------------------------------------------------------
def basic_block_forward(x_nchw, prepared, in_features, out_features, stride=1):
    n, c, h, w = x_nchw.shape
    assert c == in_features
    use_proj = "wcat" in prepared
    if not use_proj and stride != 1:
        raise ValueError("identity shortcut with stride != 1 (mirrors PyTorch shape bug)")

    cin_p = prepared["cin_p"]
    cmid_p = prepared["cmid_p"]
    cout_p = prepared["cout_p"]
    if not use_proj:
        assert cin_p == cout_p

    # A strided 1x1 conv is spatial subsampling followed by the 1x1 conv;
    # conv1 and the projection shortcut share the same stride.
    xs = x_nchw[:, :, ::stride, ::stride]
    n_, _, ho, wo = xs.shape

    # TODO(synk): in a full network keep activations NHWC end-to-end; this
    # NCHW->rows transpose (and the inverse below) is host-side XLA glue kept
    # only to match the PyTorch NCHW interface.
    x_rows = jnp.transpose(xs, (0, 2, 3, 1)).reshape(n_ * ho * wo, c)
    rows = x_rows.shape[0]

    tm = _choose_tm(rows, cin_p, cmid_p, cout_p)
    grid_m = pl.cdiv(rows, tm)
    rows_p = grid_m * tm

    # Pad rows to the tile and channels to the lane-aligned width; cast to bf16.
    x_rows = jnp.pad(x_rows, ((0, rows_p - rows), (0, cin_p - c))).astype(jnp.bfloat16)

    row_in = pl.BlockSpec((tm, cin_p), lambda i: (i, 0))

    def full(arr):
        return pl.BlockSpec(arr.shape, lambda i: (0, 0))

    if use_proj:
        kernel = functools.partial(_block_kernel_proj, mid_p=cmid_p)
        args = (x_rows, prepared["wcat"], prepared["bcat"],
                prepared["w2"], prepared["b2"], prepared["w3"], prepared["b3"])
        in_specs = [row_in,
                    full(prepared["wcat"]), full(prepared["bcat"]),
                    full(prepared["w2"]), full(prepared["b2"]),
                    full(prepared["w3"]), full(prepared["b3"])]
    else:
        kernel = _block_kernel_identity
        args = (x_rows, prepared["w1"], prepared["b1"],
                prepared["w2"], prepared["b2"], prepared["w3"], prepared["b3"])
        in_specs = [row_in,
                    full(prepared["w1"]), full(prepared["b1"]),
                    full(prepared["w2"]), full(prepared["b2"]),
                    full(prepared["w3"]), full(prepared["b3"])]

    out_rows = pl.pallas_call(
        kernel,
        out_shape=jax.ShapeDtypeStruct((rows_p, cout_p), jnp.float32),
        grid_spec=pltpu.PrefetchScalarGridSpec(
            num_scalar_prefetch=0,
            grid=(grid_m,),
            in_specs=in_specs,
            out_specs=pl.BlockSpec((tm, cout_p), lambda i: (i, 0)),
        ),
        compiler_params=pltpu.CompilerParams(
            dimension_semantics=("parallel",)),
    )(*args)

    # (rows_p, Cout_p) -> strip padding -> NHWC -> NCHW
    out = out_rows[:rows, :out_features].reshape(n_, ho, wo, out_features)
    return jnp.transpose(out, (0, 3, 1, 2))


# ----------------------------------------------------------------------------
# Pure-JAX reference (same prepared params / same bf16 math) for correctness
# ----------------------------------------------------------------------------
def basic_block_reference(x_nchw, prepared, in_features, out_features, stride=1):
    xs = x_nchw[:, :, ::stride, ::stride]
    n, c, ho, wo = xs.shape
    cin_p = prepared["cin_p"]
    cmid_p = prepared["cmid_p"]

    x_rows = jnp.transpose(xs, (0, 2, 3, 1)).reshape(-1, c)
    x_rows = jnp.pad(x_rows, ((0, 0), (0, cin_p - c))).astype(jnp.bfloat16)

    if "wcat" in prepared:
        t = jnp.dot(x_rows, prepared["wcat"],
                    preferred_element_type=jnp.float32) + prepared["bcat"]
        h = jnp.maximum(t[:, :cmid_p], 0.0)
        sc = t[:, cmid_p:]
    else:
        h = jnp.maximum(jnp.dot(x_rows, prepared["w1"],
                                preferred_element_type=jnp.float32) + prepared["b1"], 0.0)
        sc = x_rows.astype(jnp.float32)

    h = jnp.maximum(jnp.dot(h.astype(jnp.bfloat16), prepared["w2"],
                            preferred_element_type=jnp.float32) + prepared["b2"], 0.0)
    y = jnp.dot(h.astype(jnp.bfloat16), prepared["w3"],
                preferred_element_type=jnp.float32) + prepared["b3"]
    out = jnp.maximum(y + sc, 0.0)[:, :out_features]
    out = out.reshape(n, ho, wo, out_features)
    return jnp.transpose(out, (0, 3, 1, 2))


# ----------------------------------------------------------------------------
if __name__ == "__main__":
    # TODO(synk): BatchNorm is implemented in inference mode (running stats
    # folded to scale/bias); training-mode batch statistics are not computed.
    N, H, W = 2, 8, 8
    key = jax.random.PRNGKey(0)
    kx1, kp1, kx2, kp2 = jax.random.split(key, 4)

    # Case 1: projection shortcut (in_features != out_features).
    Cin, Cmid, Cout = 16, 16, 32
    x1 = jax.random.normal(kx1, (N, Cin, H, W), jnp.float32)
    raw1 = make_params(kp1, Cin, Cmid, Cout)
    prep1 = prepare_params(raw1, Cin, Cmid, Cout)
    out1 = jax.block_until_ready(basic_block_forward(x1, prep1, Cin, Cout, stride=1))
    ref1 = basic_block_reference(x1, prep1, Cin, Cout, stride=1)
    assert out1.shape == (N, Cout, H, W)
    assert jnp.allclose(out1, ref1, atol=2e-3, rtol=2e-3), "proj-shortcut mismatch vs reference"

    # Case 2: identity shortcut (in_features == out_features).
    Cin2 = Cout2 = 32
    Cmid2 = 16
    x2 = jax.random.normal(kx2, (N, Cin2, H, W), jnp.float32)
    raw2 = make_params(kp2, Cin2, Cmid2, Cout2)
    prep2 = prepare_params(raw2, Cin2, Cmid2, Cout2)
    out2 = jax.block_until_ready(basic_block_forward(x2, prep2, Cin2, Cout2, stride=1))
    ref2 = basic_block_reference(x2, prep2, Cin2, Cout2, stride=1)
    assert out2.shape == (N, Cout2, H, W)
    assert jnp.allclose(out2, ref2, atol=2e-3, rtol=2e-3), "identity-shortcut mismatch vs reference"

    print("KERNEL_OK")
</pallas_src>

<mosaic_0001>
module attributes {stable_mosaic.version = 11 : i64} {
  func.func @_block_kernel_proj(%arg0: i32, %arg1: memref<64x128xbf16, #tpu.memory_space<vmem>>, %arg2: memref<128x256xbf16, #tpu.memory_space<vmem>>, %arg3: memref<1x256xf32, #tpu.memory_space<vmem>>, %arg4: memref<128x128xbf16, #tpu.memory_space<vmem>>, %arg5: memref<1x128xf32, #tpu.memory_space<vmem>>, %arg6: memref<128x128xbf16, #tpu.memory_space<vmem>>, %arg7: memref<1x128xf32, #tpu.memory_space<vmem>>, %arg8: memref<64x128xf32, #tpu.memory_space<vmem>>) attributes {dimension_semantics = [#tpu.dimension_semantics<parallel>], iteration_bounds = array<i64: 2>, scalar_prefetch = 0 : i64, scratch_operands = 0 : i64, tpu.core_type = #tpu.core_type<tc>, window_params = [{transform_indices = @transform_0, window_bounds = array<i64: 64, 128>}, {pipeline_mode = #tpu.pipeline_mode<synchronous>, transform_indices = @transform_1, window_bounds = array<i64: 128, 256>}, {pipeline_mode = #tpu.pipeline_mode<synchronous>, transform_indices = @transform_2, window_bounds = array<i64: 1, 256>}, {pipeline_mode = #tpu.pipeline_mode<synchronous>, transform_indices = @transform_3, window_bounds = array<i64: 128, 128>}, {pipeline_mode = #tpu.pipeline_mode<synchronous>, transform_indices = @transform_4, window_bounds = array<i64: 1, 128>}, {pipeline_mode = #tpu.pipeline_mode<synchronous>, transform_indices = @transform_5, window_bounds = array<i64: 128, 128>}, {pipeline_mode = #tpu.pipeline_mode<synchronous>, transform_indices = @transform_6, window_bounds = array<i64: 1, 128>}, {transform_indices = @transform_7, window_bounds = array<i64: 64, 128>}]} {
    %c0 = arith.constant 0 : index
    %c0_0 = arith.constant 0 : index
    %0 = vector.load %arg1[%c0, %c0_0] : memref<64x128xbf16, #tpu.memory_space<vmem>>, vector<64x128xbf16>
    %c0_1 = arith.constant 0 : index
    %c0_2 = arith.constant 0 : index
    %1 = vector.load %arg2[%c0_1, %c0_2] : memref<128x256xbf16, #tpu.memory_space<vmem>>, vector<128x256xbf16>
    %cst = arith.constant dense<0.000000e+00> : vector<64x256xf32>
    %2 = tpu.matmul %0, %1, %cst {dimension_numbers = #tpu.dot_dimension_numbers<[1], [0], [0], [1], [0, 0, 1, 1], [], []>} : vector<64x128xbf16>, vector<128x256xbf16>, vector<64x256xf32> -> vector<64x256xf32>
    %c0_3 = arith.constant 0 : index
    %c0_4 = arith.constant 0 : index
    %3 = vector.load %arg3[%c0_3, %c0_4] : memref<1x256xf32, #tpu.memory_space<vmem>>, vector<1x256xf32>
    %4 = vector.broadcast %3 : vector<1x256xf32> to vector<64x256xf32>
    %5 = arith.addf %2, %4 : vector<64x256xf32>
    %6 = vector.extract_strided_slice %5 {offsets = [0, 0], sizes = [64, 128], strides = [1, 1]} : vector<64x256xf32> to vector<64x128xf32>
    %cst_5 = arith.constant 0.000000e+00 : f32
    %7 = vector.broadcast %cst_5 : f32 to vector<64x128xf32>
    %8 = arith.maximumf %6, %7 : vector<64x128xf32>
    %9 = vector.extract_strided_slice %5 {offsets = [0, 128], sizes = [64, 128], strides = [1, 1]} : vector<64x256xf32> to vector<64x128xf32>
    %10 = arith.truncf %8 : vector<64x128xf32> to vector<64x128xbf16>
    %c0_6 = arith.constant 0 : index
    %c0_7 = arith.constant 0 : index
    %11 = vector.load %arg4[%c0_6, %c0_7] : memref<128x128xbf16, #tpu.memory_space<vmem>>, vector<128x128xbf16>
    %cst_8 = arith.constant dense<0.000000e+00> : vector<64x128xf32>
    %12 = tpu.matmul %10, %11, %cst_8 {dimension_numbers = #tpu.dot_dimension_numbers<[1], [0], [0], [1], [0, 0, 1, 1], [], []>} : vector<64x128xbf16>, vector<128x128xbf16>, vector<64x128xf32> -> vector<64x128xf32>
    %c0_9 = arith.constant 0 : index
    %c0_10 = arith.constant 0 : index
    %13 = vector.load %arg5[%c0_9, %c0_10] : memref<1x128xf32, #tpu.memory_space<vmem>>, vector<1x128xf32>
    %14 = vector.broadcast %13 : vector<1x128xf32> to vector<64x128xf32>
    %15 = arith.addf %12, %14 : vector<64x128xf32>
    %cst_11 = arith.constant 0.000000e+00 : f32
    %16 = vector.broadcast %cst_11 : f32 to vector<64x128xf32>
    %17 = arith.maximumf %15, %16 : vector<64x128xf32>
    %18 = arith.truncf %17 : vector<64x128xf32> to vector<64x128xbf16>
    %c0_12 = arith.constant 0 : index
    %c0_13 = arith.constant 0 : index
    %19 = vector.load %arg6[%c0_12, %c0_13] : memref<128x128xbf16, #tpu.memory_space<vmem>>, vector<128x128xbf16>
    %cst_14 = arith.constant dense<0.000000e+00> : vector<64x128xf32>
    %20 = tpu.matmul %18, %19, %cst_14 {dimension_numbers = #tpu.dot_dimension_numbers<[1], [0], [0], [1], [0, 0, 1, 1], [], []>} : vector<64x128xbf16>, vector<128x128xbf16>, vector<64x128xf32> -> vector<64x128xf32>
    %c0_15 = arith.constant 0 : index
    %c0_16 = arith.constant 0 : index
    %21 = vector.load %arg7[%c0_15, %c0_16] : memref<1x128xf32, #tpu.memory_space<vmem>>, vector<1x128xf32>
    %22 = vector.broadcast %21 : vector<1x128xf32> to vector<64x128xf32>
    %23 = arith.addf %20, %22 : vector<64x128xf32>
    %24 = arith.addf %23, %9 : vector<64x128xf32>
    %cst_17 = arith.constant 0.000000e+00 : f32
    %25 = vector.broadcast %cst_17 : f32 to vector<64x128xf32>
    %26 = arith.maximumf %24, %25 : vector<64x128xf32>
    %c0_18 = arith.constant 0 : index
    %c0_19 = arith.constant 0 : index
    %27 = vector.load %arg8[%c0_18, %c0_19] : memref<64x128xf32, #tpu.memory_space<vmem>>, vector<64x128xf32>
    tpu.vector_store %arg8[%c0_18, %c0_19], %26 {strides = array<i32>} : memref<64x128xf32, #tpu.memory_space<vmem>>, vector<64x128xf32>,
    return
  }
  func.func @transform_0(%arg0: i32) -> (i32, i32) {
    %c0_i32 = arith.constant 0 : i32
    %c0_i32_0 = arith.constant 0 : i32
    return %arg0, %c0_i32 : i32, i32
  }
  func.func @transform_1(%arg0: i32) -> (i32, i32) {
    %c0_i32 = arith.constant 0 : i32
    %c0_i32_0 = arith.constant 0 : i32
    %c0_i32_1 = arith.constant 0 : i32
    return %c0_i32, %c0_i32_0 : i32, i32
  }
  func.func @transform_2(%arg0: i32) -> (i32, i32) {
    %c0_i32 = arith.constant 0 : i32
    %c0_i32_0 = arith.constant 0 : i32
    %c0_i32_1 = arith.constant 0 : i32
    return %c0_i32, %c0_i32_0 : i32, i32
  }
  func.func @transform_3(%arg0: i32) -> (i32, i32) {
    %c0_i32 = arith.constant 0 : i32
    %c0_i32_0 = arith.constant 0 : i32
    %c0_i32_1 = arith.constant 0 : i32
    return %c0_i32, %c0_i32_0 : i32, i32
  }
  func.func @transform_4(%arg0: i32) -> (i32, i32) {
    %c0_i32 = arith.constant 0 : i32
    %c0_i32_0 = arith.constant 0 : i32
    %c0_i32_1 = arith.constant 0 : i32
    return %c0_i32, %c0_i32_0 : i32, i32
  }
  func.func @transform_5(%arg0: i32) -> (i32, i32) {
    %c0_i32 = arith.constant 0 : i32
    %c0_i32_0 = arith.constant 0 : i32
    %c0_i32_1 = arith.constant 0 : i32
    return %c0_i32, %c0_i32_0 : i32, i32
  }
  func.func @transform_6(%arg0: i32) -> (i32, i32) {
    %c0_i32 = arith.constant 0 : i32
    %c0_i32_0 = arith.constant 0 : i32
    %c0_i32_1 = arith.constant 0 : i32
    return %c0_i32, %c0_i32_0 : i32, i32
  }
  func.func @transform_7(%arg0: i32) -> (i32, i32) {
    %c0_i32 = arith.constant 0 : i32
    %c0_i32_0 = arith.constant 0 : i32
    return %arg0, %c0_i32 : i32, i32
  }
}

</mosaic_0001>

<bundles_post_ra>
// kernel: tpu_custom_call.1
= control target key start
LH: loop header
LB: loop body
LE: loop exit
PB: predicated region body
PF: predicated region fallthrough
CT: control target
= control target key end

     0   :  { %s1766_s0 = inlined_call_operand.hbm [shape: bf16[128,128], index: 0, kind: input, shape index: {}]   ;;  %s1767_s1 = inlined_call_operand.hbm [shape: bf16[128,256], index: 1, kind: input, shape index: {}]   ;;  %s1768_s2 = inlined_call_operand.vmem [shape: f32[1,256], index: 2, kind: input, shape index: {}]   ;;  %s1769_s3 = inlined_call_operand.hbm [shape: bf16[128,128], index: 3, kind: input, shape index: {}]   ;;  %s1770_s4 = inlined_call_operand.vmem [shape: f32[1,128], index: 4, kind: input, shape index: {}]   ;;  %s1771_s5 = inlined_call_operand.hbm [shape: bf16[128,128], index: 5, kind: input, shape index: {}]   ;;  %s1772_s6 = inlined_call_operand.vmem [shape: f32[1,128], index: 6, kind: input, shape index: {}]   ;;  %s1773_s7 = inlined_call_operand.hbm [shape: f32[128,128], index: 7, kind: output, shape index: {}]  }
   0x1   :  { %1780 = sst [smem:[#allocation15_spill]] %s1767_s1 }
   0x2   :  { %12 = vsyncpa [#allocation3], 0 }
   0x3   :  { %14 = vsyncpa [#allocation3 + $0x1], 0 }
   0x4   :  { %15 = vsyncpa [#allocation6], 0 }
   0x5   :  { %16 = vsyncpa [#allocation9], 0 }
   0x6   :  { %17 = vsyncpa [#allocation4], 0 }
   0x7   :  { %19 = vsyncpa [#allocation4 + $0x1], 0  ;;  %s1501_s24 = smov 0   ;;  %s1503_s25 = smov 0  }
   0x8   :  { %s1505_s26 = smov 0   ;;  %s1507_s27 = smov 0  }
   0x9 LB: > { %s1522_s28 = sadd.s32 4294967295, %s1447_s27   ;;  %s993_s29 = sadd.s32 4294967294, %s1447_s27   ;;  %s1447_s27 = sphi %s1507_s27, %s1803_s27   ;;  %s1443_s26 = sphi %s1505_s26, %s1802_s26   ;;  %s1439_s25 = sphi %s1503_s25, %s1801_s25   ;;  %s1435_s24 = sphi %s1501_s24, %s1800_s24  }
   0xa   : > { %p45_p0 = scmp.ne.s32.totalorder %s1439_s25, %s1435_s24  ;;  %p1774_p1 = scmp.eq.s32.totalorder %s1522_s28, 0 }
   0xb   : > { %p201_p3 = scmp.eq.s32.totalorder %s993_s29, 1  ;;  %p994_p5 = scmp.ge.s32.totalorder %s1447_s27, 1 }
   0xc   : > { %p1531_p4 = por %p1774_p1, %p45_p0  ;;  %p208_p7 = scmp.lt.s32.totalorder %s1447_s27, 3 }
   0xd   : > { %p1536_p6 = por %p201_p3, %p45_p0  ;;  %s1449_s10 = smov [#allocation5]  }
   0xe   : > { %s1781_s30 = scalar_select %p1531_p4, 1, 0 }
   0xf   : > { %s1782_s8 = scalar_select %p1536_p6, 1, 0 }
  0x10   : > { %p1541_p8 = pnand %p994_p5, %p208_p7  ;;  %s220_s11 = sshll.u32 %s1449_s10, 4  ;;  %s221_s11 = int_to_ptr.vmem [resolvable:$true] %s220_s11 }
  0x11   : > { %s1450_s13 = smov [#allocation7]   ;;  %s1280_s15 = scalar_lea.vmem %s221_s11, 2048 }
  0x12   : > { %s1783_s9 = scalar_select %p1541_p8, 1, 0 }
  0x13   : > { %p1157_p9 = pneg %p1541_p8  ;;  %s236_s14 = sshll.u32 %s1450_s13, 4  ;;  %s237_s14 = int_to_ptr.vmem [resolvable:$true] %s236_s14 }
  0x14   : > { %p1281_p13 = scmp.ne.s32.totalorder %s221_s11, %s1280_s15  ;;  %p1288_p5 = scmp.lt.s32.totalorder %s221_s11, %s221_s11 }
  0x15   : > { %p1550_p11 = pnand %p1157_p9, %p1774_p1  ;;  %p1289_p7 = scmp.lt.s32.totalorder %s1280_s15, %s1280_s15 }
  0x17   : > { %p1271_p12 = pneg %p1550_p11  ;;  %p1290_p10 = por %p1289_p7, %p1288_p5 }
  0x19   : > { %p1283_p0 = pnand %p1281_p13, %p1271_p12 }
  0x1b   : > { %p1284_p3 = pneg %p1283_p0 }
  0x1d   : > { %p1291_p9 = pnand %p1290_p10, %p1284_p3 }
  0x1f   : > { %1294 = shalt.err (!%p1291_p9)
}
  0x20   : > { %s1451_s16 = smov 128   ;;  %s1452_s17 = smov 8  }
  0x21   : > { %s1785_s1 = sld [smem:[#allocation15_spill]]  ;;  %s1306_s20 = scalar_lea.vmem %s237_s14, 1024 }
  0x22   : > { %p1307_p1 = scmp.ne.s32.totalorder %s237_s14, %s1306_s20  ;;  %p1314_p2 = scmp.lt.s32.totalorder %s237_s14, %s237_s14 }
  0x23   : > { %p1315_p6 = scmp.lt.s32.totalorder %s1306_s20, %s1306_s20 }
  0x24   : > { %p1309_p13 = pnand %p1307_p1, %p1271_p12 }
  0x25   : > { %p1316_p5 = por %p1315_p6, %p1314_p2 }
  0x26   : > { %p1310_p0 = pneg %p1309_p13 }
  0x27   : > { %1160 = dma.hbm_to_vmem [thread:$0]  (!%p1550_p11), %s1785_s1, 2048, %s221_s11, [#allocation6], %s1451_s16, %s1451_s16, %s1452_s17  }
  0x28   : > { %p1317_p10 = pnand %p1316_p5, %p1310_p0 }
  0x2a   : > { %1320 = shalt.err (!%p1317_p10)
}
  0x2b   : > { %s1775_s21 = smov 64   ;;  %s1776_s22 = smov 4  }
  0x2c   : > { %1163 = dma.hbm_to_vmem [thread:$0]  (!%p1550_p11), %s1769_s3, 1024, %s237_s14, [#allocation6], %s1775_s21, %s1775_s21, %s1776_s22  }
  0x2d   : > { %s1455_s10 = smov [#allocation8]   ;;  %s1576_s13 = sadd.s32 1, %s1447_s27  }
  0x2e   : > { %s252_s11 = sshll.u32 %s1455_s10, 4  ;;  %s253_s11 = int_to_ptr.vmem [resolvable:$true] %s252_s11 }
  0x2f   : > { %s1332_s15 = scalar_lea.vmem %s253_s11, 1024  ;;  %p1340_p3 = scmp.lt.s32.totalorder %s253_s11, %s253_s11 }
  0x30   : > { %p1333_p1 = scmp.ne.s32.totalorder %s253_s11, %s1332_s15  ;;  %p1341_p7 = scmp.lt.s32.totalorder %s1332_s15, %s1332_s15 }
  0x32   : > { %p1335_p2 = pnand %p1333_p1, %p1271_p12  ;;  %p1342_p9 = por %p1341_p7, %p1340_p3 }
  0x34   : > { %p1336_p6 = pneg %p1335_p2 }
  0x36   : > { %p1343_p13 = pnand %p1342_p9, %p1336_p6 }
  0x38   : > { %1346 = shalt.err (!%p1343_p13)
}
  0x39   : > { %1166 = dma.hbm_to_vmem [thread:$0]  (!%p1550_p11), %s1771_s5, 1024, %s253_s11, [#allocation9], %s1775_s21, %s1775_s21, %s1776_s22  }
  0x3a   : > { %s29_s17 = ssub.s32 %s1447_s27, %s1576_s13  ;;  %s32_s12 = sadd.s32 1, %s1443_s26 }
  0x3b   : > { %p30_p12 = scmp.eq.s32.totalorder %s29_s17, 0  ;;  %p39_p0 = scmp.ne.s32.totalorder %s1443_s26, %s1439_s25 }
  0x3c   : > { %p40_p5 = scmp.eq.s32.totalorder %s1447_s27, 0  ;;  %p1178_p10 = scmp.lt.s32.totalorder %s1447_s27, 2 }
  0x3d   : > { %s1597_s18 = scalar_select %p30_p12, %s1443_s26, %s32_s12  }
  0x3e   : > { %p41_p1 = por %p40_p5, %p39_p0  ;;  %p1786_p2 = scmp.eq.s32.totalorder %s1522_s28, 1 }
  0x3f   : > { %s269_s20 = sand.u32 1, %s1443_s26   ;;  %s1051_s23 = sshll.u32 %s1447_s27, 9 }
  0x40   : > { %p1601_p6 = por %p1786_p2, %p39_p0  ;;  %s999_s29 = sshll.u32 %s269_s20, 5 }
  0x41   : > { %s1610_s11 = scalar_lea.hbm %s1766_s0, %s1051_s23  ;;  %s273_s14 = scalar_lea.vmem [#allocation2], %s999_s29 }
  0x42   : > { %s1787_s19 = scalar_select %p1601_p6, 1, 0 }
  0x43   : > { %s280_s16 = sshll.u32 %s273_s14, 4  ;;  %p1612_p11 = pnand %p1178_p10, %p41_p1  ;;  %s1616_s16 = int_to_ptr.vmem [resolvable:$true] %s280_s16 }
  0x44   : > { %s1618_s12 = scalar_lea.sflag [#allocation3], %s269_s20  ;;  %s1347_s21 = scalar_lea.hbm %s1610_s11, 512 }
  0x45   : > { %p1348_p3 = scmp.ne.s32.totalorder %s1610_s11, %s1347_s21  ;;  %p1349_p7 = pneg %p1612_p11 }
  0x46   : > { %s1352_s29 = scalar_lea.hbm %s1766_s0, 1024  ;;  %p1353_p12 = scmp.lt.s32.totalorder %s1610_s11, %s1766_s0 }
  0x47   : > { %p1350_p9 = pnand %p1349_p7, %p1348_p3  ;;  %p1354_p0 = scmp.lt.s32.totalorder %s1352_s29, %s1347_s21 }
  0x49   : > { %p1351_p13 = pneg %p1350_p9  ;;  %p1355_p5 = por %p1354_p0, %p1353_p12 }
  0x4b   : > { %p1356_p10 = pnand %p1355_p5, %p1351_p13 }
  0x4d   : > { %1359 = shalt.err (!%p1356_p10)
}
  0x4e   : > { %s1360_s20 = scalar_lea.vmem %s1616_s16, 512  ;;  %s1456_s22 = smov [#allocation2]  }
  0x4f   : > { %p1361_p1 = scmp.ne.s32.totalorder %s1616_s16, %s1360_s20  ;;  %s1365_s1 = sshll.u32 %s1456_s22, 4  ;;  %s1366_s1 = int_to_ptr.vmem [resolvable:$false] %s1365_s1 }
  0x50   : > { %s1367_s23 = scalar_lea.vmem %s1366_s1, 1024  ;;  %p1368_p9 = scmp.lt.s32.totalorder %s1616_s16, %s1366_s1 }
  0x51   : > { %p1363_p2 = pnand %p1361_p1, %p1349_p7  ;;  %p1369_p6 = scmp.lt.s32.totalorder %s1367_s23, %s1360_s20 }
  0x53   : > { %p1364_p3 = pneg %p1363_p2  ;;  %p1370_p4 = por %p1369_p6, %p1368_p9 }
  0x55   : > { %p1371_p8 = pnand %p1370_p4, %p1364_p3 }
  0x57   : > { %1374 = shalt.err (!%p1371_p8)
}
  0x58   : > { %s1789_s21 = smov 4   ;;  %s1790_s10 = smov 64  }
  0x59   : > { %1170 = dma.hbm_to_vmem [thread:$0]  (!%p1612_p11), %s1610_s11, 512, %s1616_s16, %s1618_s12, %s1790_s10, %s1790_s10, %s1789_s21  }
  0x5a   : > { %p1791_p7 = scmp.ne.s32.totalorder %s1783_s9, 0 }
  0x5b   : > { %s1645_s22 = sand.u32 (!%p1791_p7), 1, %s1439_s25   ;;  %p1792_p4 = scmp.ne.s32.totalorder (!%p1791_p7), %s1781_s30, 0 }
  0x5c   : > { %292 = sbr.rel (%p1791_p7) target bundleno = 790 (0x316), region = 48  ;;  %s1003_s1 = sshll.u32 (!%p1791_p7), %s1645_s22, 5 }
  0x5d   : > { %s295_s29 = scalar_lea.sflag (!%p1791_p7), [#allocation3], %s1645_s22  ;;  %s1649_s15 = scalar_lea.vmem (!%p1791_p7), [#allocation2], %s1003_s1 }
  0x61   : > { %1418 = dma.done.wait (%p1792_p4), %s295_s29, 512  }
  0x62   : > { %1420 = vsyncadd (%p1792_p4), %s295_s29, 4294966784  ;;  %p1793_p8 = scmp.eq.s32.totalorder %s1522_s28, 0 }
  0x64   : > { %1422 = dma.done.wait (%p1793_p8), [#allocation6], 3072   ;;  %p1794_p6 = pmov %p1793_p8 }
  0x66   : > { %1424 = vsyncadd (%p1794_p6), [#allocation6], 4294964224  ;;  %p1795_p11 = pmov %p1794_p6 }
  0x67   : > { %p1796_p13 = pmov %p1794_p6 }
  0x68   : > { %1426 = dma.done.wait (%p1795_p11), [#allocation9], 1024  }
  0x69   : > { %1428 = vsyncadd (%p1796_p13), [#allocation9], 4294966272  ;;  %v1457_v0 = vmov 0   ;;  %v1225_v1 = vld [vmem:[#allocation5 + $0x74] ss:$8 sps:$4 sm:$0xff]   ;;  %v1255_v16 = vld [vmem:[#allocation7 + $0x28] sm:$0xff]   ;;  %v370_v34 = vlaneseq }
  0x6a   : > { %516 = vmatprep.mubr.bf16.mxu0 %v1457_v0  ;;  %v1227_v2 = vld [vmem:[#allocation5 + $0x70] ss:$8 sps:$4 sm:$0xff]   ;;  %484 = vmatprep.subr.bf16.mxu0 %v1225_v1  ;;  %v1228_v3 = vld [vmem:[#allocation5 + $0x64] ss:$8 sps:$4 sm:$0xff]   ;;  %v1230_v4 = vld [vmem:[#allocation5 + $0x60] ss:$8 sps:$4 sm:$0xff]  }
  0x6b   : > { %485 = vmatpush1.bf16.msra.mxu0 %v1227_v2  ;;  %v1231_v5 = vld [vmem:[#allocation5 + $0x54] ss:$8 sps:$4 sm:$0xff]   ;;  %v1233_v6 = vld [vmem:[#allocation5 + $0x50] ss:$8 sps:$4 sm:$0xff]   ;;  %v1234_v7 = vld [vmem:[#allocation5 + $0x44] ss:$8 sps:$4 sm:$0xff]  }
  0x6c   : > { %486 = vmatprep.subr.bf16.mxu0 %v1228_v3  ;;  %v1236_v8 = vld [vmem:[#allocation5 + $0x40] ss:$8 sps:$4 sm:$0xff]   ;;  %v1237_v9 = vld [vmem:[#allocation5 + $0x34] ss:$8 sps:$4 sm:$0xff]   ;;  %v1239_v10 = vld [vmem:[#allocation5 + $0x30] ss:$8 sps:$4 sm:$0xff]  }
  0x6d   : > { %v1240_v11 = vld [vmem:[#allocation5 + $0x24] ss:$8 sps:$4 sm:$0xff]   ;;  %v1253_v12 = vld [vmem:[#allocation7 + $0x38] sm:$0xff]   ;;  %v1254_v13 = vld [vmem:[#allocation7 + $0x30] sm:$0xff]   ;;  %v1667_v35 = vshrl.u32 %v370_v34, 7  ;;  %s1007_s14 = sshll.u32 %s1645_s22, 6 }
  0x6e   : > { %v1242_v14 = vld [vmem:[#allocation5 + $0x20] ss:$8 sps:$4 sm:$0xff]   ;;  %1077 = vmatprep.subr.bf16.mxu1 %v1253_v12  ;;  %v1243_v15 = vld [vmem:[#allocation5 + $0x14] ss:$8 sps:$4 sm:$0xff]   ;;  %v1245_v17 = vld [vmem:[#allocation5 + $0x10] ss:$8 sps:$4 sm:$0xff]  }
  0x6f   : > { %487 = vmatpush1.bf16.msra.mxu0 %v1230_v4  ;;  %1078 = vmatpush3.bf16.msra.mxu1 %v1253_v12  ;;  %v1256_v18 = vld [vmem:[#allocation7 + $0x20] sm:$0xff]   ;;  %v1250_v22 = vld [vmem:[%s1649_s15 + $0x8] sm:$0xff]   ;;  %v1251_v23 = vld [vmem:[%s1649_s15 + $0x10] sm:$0xff]   ;;  %v372_v36 = vsub.s32 0, %v1667_v35  ;;  %s1703_s20 = scalar_lea.vmem [#allocation10], %s1007_s14  ;;  %s1052_s21 = sshll.u32 %s1522_s28, 10 }
  0x70   : > { %488 = vmatprep.subr.bf16.mxu0 %v1231_v5  ;;  %1079 = vmatprep.subr.bf16.mxu1 %v1254_v13  ;;  %v1246_v19 = vld [vmem:[#allocation5 + $0x4] ss:$8 sps:$4 sm:$0xff]   ;;  %v1248_v20 = vld [vmem:[#allocation5] ss:$8 sps:$4 sm:$0xff]   ;;  %v1252_v24 = vld [vmem:[%s1649_s15 + $0x18] sm:$0xff]   ;;  %s891_s23 = sshll.u32 %s1703_s20, 4  ;;  %s1721_s29 = scalar_lea.hbm %s1773_s7, %s1052_s21  ;;  %s1715_s23 = int_to_ptr.vmem [resolvable:$true] %s891_s23 }
  0x71   : > { %v1249_v21 = vld [vmem:[%s1649_s15] sm:$0xff]   ;;  %v1257_v25 = vld [vmem:[#allocation7 + $0x18] sm:$0xff]   ;;  %v1258_v26 = vld [vmem:[#allocation7 + $0x10] sm:$0xff]   ;;  %s878_s15 = scalar_lea.sflag [#allocation4], %s1645_s22  ;;  %s1375_s30 = scalar_lea.vmem %s1715_s23, 1024 }
  0x72   : > { %v1259_v27 = vld [vmem:[#allocation7 + $0x8] sm:$0xff]   ;;  %v1260_v28 = vld [vmem:[#allocation7] sm:$0xff]   ;;  %v1261_v29 = vld [vmem:[#allocation8 + $0x38] sm:$0xff]   ;;  %p1376_p12 = scmp.ne.s32.totalorder %s1715_s23, %s1375_s30  ;;  %p1797_p0 = scmp.ne.s32.totalorder %s1787_s19, 0 }
  0x73   : > { %489 = vmatpush1.bf16.msra.mxu0 %v1233_v6  ;;  %1080 = vmatpush3.bf16.msra.mxu1 %v1254_v13  ;;  %v1262_v30 = vld [vmem:[#allocation8 + $0x30] sm:$0xff]   ;;  %v1263_v31 = vld [vmem:[#allocation8 + $0x28] sm:$0xff]   ;;  %v1264_v32 = vld [vmem:[#allocation8 + $0x20] sm:$0xff]   ;;  %s1458_s28 = smov [#allocation10]  }
  0x74   : > { %490 = vmatprep.subr.bf16.mxu0 %v1234_v7  ;;  %1081 = vmatprep.subr.bf16.mxu1 %v1255_v16  ;;  %v1265_v33 = vld [vmem:[#allocation8 + $0x18] sm:$0xff]   ;;  %v1673_v37 = vld [vmem:[%s1768_s2] sm:$0x3]  ;;  %p1377_p5 = pnand %p1376_p12, %p1797_p0  ;;  %s1379_s9 = sshll.u32 %s1458_s28, 4  ;;  %s1380_s9 = int_to_ptr.vmem [resolvable:$false] %s1379_s9 }
  0x75   : > { %v373_v38 = vrot.slane %v1673_v37, %v372_v36  ;;  %v1268_v12 = vld [vmem:[#allocation8] sm:$0xff]   ;;  %s1381_s11 = scalar_lea.vmem %s1380_s9, 2048  ;;  %p1382_p1 = scmp.lt.s32.totalorder %s1715_s23, %s1380_s9 }
  0x76   : > { %p1378_p10 = pneg %p1377_p5  ;;  %p1383_p2 = scmp.lt.s32.totalorder %s1381_s11, %s1375_s30 }
  0x77   : > { %491 = vmatpush1.bf16.msra.mxu0 %v1236_v8  ;;  %1082 = vmatpush3.bf16.msra.mxu1 %v1255_v16 }
  0x78   : > { %492 = vmatprep.subr.bf16.mxu0 %v1237_v9  ;;  %1083 = vmatprep.subr.bf16.mxu1 %v1256_v18  ;;  %p1384_p3 = por %p1383_p2, %p1382_p1 }
  0x7a   : > { %p1385_p9 = pnand %p1384_p3, %p1378_p10 }
  0x7b   : > { %493 = vmatpush1.bf16.msra.mxu0 %v1239_v10  ;;  %1084 = vmatpush3.bf16.msra.mxu1 %v1256_v18  ;;  %v1266_v10 = vld [vmem:[#allocation8 + $0x10] sm:$0xff]  }
  0x7c   : > { %494 = vmatprep.subr.bf16.mxu0 %v1240_v11  ;;  %1085 = vmatprep.subr.bf16.mxu1 %v1257_v25  ;;  %v1267_v11 = vld [vmem:[#allocation8 + $0x8] sm:$0xff]  }
  0x7f   : > { %495 = vmatpush1.bf16.msra.mxu0 %v1242_v14  ;;  %1086 = vmatpush3.bf16.msra.mxu1 %v1257_v25 }
  0x80   : > { %496 = vmatprep.subr.bf16.mxu0 %v1243_v15  ;;  %1087 = vmatprep.subr.bf16.mxu1 %v1258_v26  ;;  %v1028_v15 = vld [vmem:[%s1770_s4] ss:$0 sm:$0xff] }
  0x83   : > { %497 = vmatpush1.bf16.msra.mxu0 %v1245_v17  ;;  %1088 = vmatpush3.bf16.msra.mxu1 %v1258_v26 }
  0x84   : > { %498 = vmatprep.subr.bf16.mxu0 %v1246_v19  ;;  %1089 = vmatprep.subr.bf16.mxu1 %v1259_v27 }
  0x87   : > { %499 = vmatpush1.bf16.msra.mxu0 %v1248_v20  ;;  %1090 = vmatpush3.bf16.msra.mxu1 %v1259_v27 }
  0x88   : > { %1091 = vmatprep.subr.bf16.mxu1 %v1260_v28  ;;  %1101 = vmatprep.subr.bf16.mxu0 %v1261_v29 }
  0x8a   : > { %517 = vmatmul.mubr.bf16.vlgmr.msra.gmra.mxu0 %v1249_v21 }
  0x8b   : > { %526 = vmatprep.mubr.bf16.mxu0 %v1457_v0  ;;  %1092 = vmatpush3.bf16.msra.mxu1 %v1260_v28 }
  0x8c   : > { %1125 = vmatprep.subr.bf16.mxu1 %v1261_v29  ;;  %1102 = vmatpush3.bf16.msra.mxu0 %v1261_v29 }
  0x8d   : > { %1103 = vmatprep.subr.bf16.mxu0 %v1262_v30 }
  0x90   : > { %1104 = vmatpush3.bf16.msra.mxu0 %v1262_v30 }
  0x91   : > { %1105 = vmatprep.subr.bf16.mxu0 %v1263_v31 }
  0x92   : > { %527 = vmatmul.mubr.bf16.gmra.mxu0 %v1250_v22 }
  0x93   : > { %536 = vmatprep.mubr.bf16.mxu0 %v1457_v0 }
  0x94   : > { %1106 = vmatpush3.bf16.msra.mxu0 %v1263_v31 }
  0x95   : > { %1107 = vmatprep.subr.bf16.mxu0 %v1264_v32 }
  0x98   : > { %1108 = vmatpush3.bf16.msra.mxu0 %v1264_v32 }
  0x99   : > { %1109 = vmatprep.subr.bf16.mxu0 %v1265_v33 }
  0x9a   : > { %537 = vmatmul.mubr.bf16.gmra.mxu0 %v1251_v23 }
  0x9b   : > { %546 = vmatprep.mubr.bf16.mxu0 %v1457_v0 }
  0x9c   : > { %1110 = vmatpush3.bf16.msra.mxu0 %v1265_v33 }
  0x9d   : > { %1111 = vmatprep.subr.bf16.mxu0 %v1266_v10 }
  0xa0   : > { %1112 = vmatpush3.bf16.msra.mxu0 %v1266_v10 }
  0xa1   : > { %1113 = vmatprep.subr.bf16.mxu0 %v1267_v11 }
  0xa2   : > { %547 = vmatmul.mubr.bf16.gmra.mxu0 %v1252_v24 }
  0xa4   : > { %1114 = vmatpush3.bf16.msra.mxu0 %v1267_v11 }
  0xa5   : > { %1115 = vmatprep.subr.bf16.mxu0 %v1268_v12 }
  0xa8   : > { %1116 = vmatpush3.bf16.msra.mxu0 %v1268_v12 }
 0x14a   : > { %v518_v39 = vpop.f32.mrf.mxu0 }
 0x14b   : > { %v519_v41 = vadd.f32 %v518_v39, %v373_v38 }
 0x14c   : > { %v1676_v40 = vpop.f32.mrf.mxu0 }
 0x14d   : > { %v557_v45 = vmax.f32 %v519_v41, 0.0 }
 0x14e   : > { %v522_v42 = vpop.f32.mrf.mxu0 }
 0x14f   : > { %v523_v43 = vadd.f32 %v522_v42, %v373_v38 }
 0x150   : > { %v1678_v44 = vpop.f32.mrf.mxu0 }
 0x151   : > { %v558_v46 = vmax.f32 %v523_v43, 0.0 }
 0x152   : > { %v528_v47 = vpop.f32.mrf.mxu0 }
 0x153   : > { %v565_v48 = vpack.c.bf16 %v558_v46, %v557_v45  ;;  %v529_v50 = vadd.f32 %v528_v47, %v373_v38  ;;  %v376_v46 = vsub.s32 1, %v1667_v35 }
 0x154   : > { %v1680_v49 = vpop.f32.mrf.mxu0 }
 0x155   : > { %1093 = vmatprep.mubr.bf16.mxu1 %v565_v48  ;;  %v559_v54 = vmax.f32 %v529_v50, 0.0  ;;  %v1037_v48 = vld [vmem:[%s1772_s6] ss:$0 sm:$0xff]  ;;  %v377_v50 = vrot.slane %v1673_v37, %v376_v46 }
 0x156   : > { %v532_v51 = vpop.f32.mrf.mxu0 }
 0x157   : > { %v533_v52 = vadd.f32 %v532_v51, %v373_v38 }
 0x158   : > { %v1682_v53 = vpop.f32.mrf.mxu0 }
 0x159   : > { %v560_v55 = vmax.f32 %v533_v52, 0.0  ;;  %v531_v52 = vadd.f32 %v1680_v49, %v377_v50  ;;  %v535_v35 = vadd.f32 %v1682_v53, %v377_v50 }
 0x15a   : > { %v538_v56 = vpop.f32.mrf.mxu0 }
 0x15b   : > { %v566_v57 = vpack.c.bf16 %v560_v55, %v559_v54  ;;  %v539_v59 = vadd.f32 %v538_v56, %v373_v38  ;;  %v521_v56 = vadd.f32 %v1676_v40, %v377_v50 }
 0x15c   : > { %v1684_v58 = vpop.f32.mrf.mxu0 }
 0x15d   : > { %1094 = vmatmul.mubr.bf16.vlgmr.msra.gmra.mxu1 %v566_v57  ;;  %v561_v63 = vmax.f32 %v539_v59, 0.0 }
 0x15e   : > { %v542_v60 = vpop.f32.mrf.mxu0  ;;  %1133 = vmatpush3.bf16.msra.mxu1 %v1261_v29 }
 0x15f   : > { %v543_v61 = vadd.f32 %v542_v60, %v373_v38  ;;  %1126 = vmatprep.subr.bf16.mxu1 %v1262_v30 }
 0x160   : > { %v1686_v62 = vpop.f32.mrf.mxu0 }
 0x161   : > { %v562_v0 = vmax.f32 %v543_v61, 0.0 }
 0x162   : > { %v548_v1 = vpop.f32.mrf.mxu0  ;;  %1134 = vmatpush3.bf16.msra.mxu1 %v1262_v30 }
 0x163   : > { %v567_v2 = vpack.c.bf16 %v562_v0, %v561_v63  ;;  %1127 = vmatprep.subr.bf16.mxu1 %v1263_v31  ;;  %v549_v4 = vadd.f32 %v548_v1, %v373_v38 }
 0x164   : > { %v1688_v3 = vpop.f32.mrf.mxu0 }
 0x165   : > { %1097 = vmatprep.mubr.bf16.mxu1 %v567_v2  ;;  %v563_v7 = vmax.f32 %v549_v4, 0.0  ;;  %v525_v2 = vadd.f32 %v1678_v44, %v377_v50  ;;  %v551_v44 = vadd.f32 %v1688_v3, %v377_v50  ;;  %v545_v3 = vadd.f32 %v1686_v62, %v377_v50 }
 0x166   : > { %v552_v5 = vpop.f32.mrf.mxu0  ;;  %1135 = vmatpush3.bf16.msra.mxu1 %v1263_v31 }
 0x167   : > { %v553_v6 = vadd.f32 %v552_v5, %v373_v38  ;;  %1128 = vmatprep.subr.bf16.mxu1 %v1264_v32 }
 0x168   : > { %v554_v47 = vpop.f32.mrf.mxu0 }
 0x169   : > { %v564_v8 = vmax.f32 %v553_v6, 0.0 }
 0x16a   : > { %1136 = vmatpush3.bf16.msra.mxu1 %v1264_v32 }
 0x16b   : > { %v568_v9 = vpack.c.bf16 %v564_v8, %v563_v7  ;;  %1129 = vmatprep.subr.bf16.mxu1 %v1265_v33 }
 0x16d   : > { %1098 = vmatmul.mubr.bf16.gmra.mxu1 %v568_v9  ;;  %v541_v9 = vadd.f32 %v1684_v58, %v377_v50 }
 0x16e   : > { %1137 = vmatpush3.bf16.msra.mxu1 %v1265_v33 }
 0x16f   : > { %1130 = vmatprep.subr.bf16.mxu1 %v1266_v10 }
 0x172   : > { %1138 = vmatpush3.bf16.msra.mxu1 %v1266_v10 }
 0x173   : > { %1131 = vmatprep.subr.bf16.mxu1 %v1267_v11 }
 0x176   : > { %1139 = vmatpush3.bf16.msra.mxu1 %v1267_v11 }
 0x177   : > { %1132 = vmatprep.subr.bf16.mxu1 %v1268_v12 }
 0x17a   : > { %1140 = vmatpush3.bf16.msra.mxu1 %v1268_v12 }
 0x21d   : > { %v1095_v13 = vpop.f32.mrf.mxu1 }
 0x21e   : > { %v683_v19 = vadd.f32 %v1095_v13, %v1028_v15  ;;  %v555_v13 = vadd.f32 %v554_v47, %v377_v50 }
 0x21f   : > { %v674_v14 = vpop.f32.mrf.mxu1 }
 0x220   : > { %v675_v17 = vadd.f32 %v1028_v15, %v674_v14  ;;  %v707_v25 = vmax.f32 %v683_v19, 0.0 }
 0x221   : > { %v1096_v16 = vpop.f32.mrf.mxu1 }
 0x222   : > { %v686_v18 = vadd.f32 %v1096_v16, %v1028_v15  ;;  %v705_v23 = vmax.f32 %v675_v17, 0.0 }
 0x223   : > { %v677_v20 = vpop.f32.mrf.mxu1 }
 0x224   : > { %v678_v21 = vadd.f32 %v1028_v15, %v677_v20  ;;  %v708_v22 = vmax.f32 %v686_v18, 0.0 }
 0x226   : > { %v706_v24 = vmax.f32 %v678_v21, 0.0  ;;  %v714_v27 = vpack.c.bf16 %v708_v22, %v707_v25 }
 0x228   : > { %v713_v26 = vpack.c.bf16 %v706_v24, %v705_v23 }
 0x22a   : > { %1117 = vmatprep.mubr.bf16.mxu0 %v713_v26 }
 0x22b   : > { %1118 = vmatmul.mubr.bf16.vlgmr.msra.gmra.mxu0 %v714_v27 }
 0x22d   : > { %v1099_v28 = vpop.f32.mrf.mxu1 }
 0x22e   : > { %v699_v33 = vadd.f32 %v1099_v28, %v1028_v15 }
 0x22f   : > { %v690_v29 = vpop.f32.mrf.mxu1 }
 0x230   : > { %v691_v31 = vadd.f32 %v1028_v15, %v690_v29  ;;  %v711_v42 = vmax.f32 %v699_v33, 0.0 }
 0x231   : > { %v1100_v30 = vpop.f32.mrf.mxu1 }
 0x232   : > { %v702_v32 = vadd.f32 %v1100_v30, %v1028_v15  ;;  %v709_v39 = vmax.f32 %v691_v31, 0.0 }
 0x233   : > { %v693_v34 = vpop.f32.mrf.mxu1 }
 0x234   : > { %v694_v36 = vadd.f32 %v1028_v15, %v693_v34  ;;  %v712_v38 = vmax.f32 %v702_v32, 0.0 }
 0x236   : > { %v710_v41 = vmax.f32 %v694_v36, 0.0  ;;  %v716_v45 = vpack.c.bf16 %v712_v38, %v711_v42 }
 0x238   : > { %v715_v43 = vpack.c.bf16 %v710_v41, %v709_v39 }
 0x23a   : > { %1121 = vmatprep.mubr.bf16.mxu1 %v715_v43 }
 0x23b   : > { %1122 = vmatmul.mubr.bf16.vlgmr.msra.gmra.mxu1 %v716_v45 }
 0x2eb   : > { %v1119_v51 = vpop.f32.mrf.mxu0 }
 0x2ec   : > { %v831_v54 = vadd.f32 %v1119_v51, %v1037_v48 }
 0x2ed   : > { %v822_v55 = vpop.f32.mrf.mxu0 }
 0x2ee   : > { %v855_v57 = vadd.f32 %v831_v54, %v531_v52  ;;  %v823_v59 = vadd.f32 %v1037_v48, %v822_v55 }
 0x2ef   : > { %v1120_v60 = vpop.f32.mrf.mxu0 }
 0x2f0   : > { %v863_v61 = vmax.f32 %v855_v57, 0.0  ;;  %v853_v63 = vadd.f32 %v823_v59, %v521_v56  ;;  %v834_v0 = vadd.f32 %v1120_v60, %v1037_v48 }
 0x2f1   : > { %v825_v1 = vpop.f32.mrf.mxu0 }
 0x2f2   : > { %871 = vst [vmem:[%s1703_s20 + $0x10] sm:$0xff] %v863_v61  ;;  %v861_v37 = vmax.f32 %v853_v63, 0.0  ;;  %v856_v40 = vadd.f32 %v834_v0, %v535_v35  ;;  %v826_v49 = vadd.f32 %v1037_v48, %v825_v1 }
 0x2f4   : > { %869 = vst [vmem:[%s1703_s20] sm:$0xff] %v861_v37  ;;  %v864_v4 = vmax.f32 %v856_v40, 0.0  ;;  %v854_v5 = vadd.f32 %v826_v49, %v525_v2 }
 0x2f6   : > { %872 = vst [vmem:[%s1703_s20 + $0x18] sm:$0xff] %v864_v4  ;;  %v862_v53 = vmax.f32 %v854_v5, 0.0 }
 0x2f8   : > { %870 = vst [vmem:[%s1703_s20 + $0x8] sm:$0xff] %v862_v53 }
 0x2fb   : > { %v1123_v6 = vpop.f32.mrf.mxu1 }
 0x2fc   : > { %v847_v7 = vadd.f32 %v1123_v6, %v1037_v48 }
 0x2fd   : > { %v838_v8 = vpop.f32.mrf.mxu1 }
 0x2fe   : > { %v859_v10 = vadd.f32 %v847_v7, %v551_v44  ;;  %v839_v11 = vadd.f32 %v1037_v48, %v838_v8 }
 0x2ff   : > { %v1124_v12 = vpop.f32.mrf.mxu1 }
 0x300   : > { %v867_v14 = vmax.f32 %v859_v10, 0.0  ;;  %v857_v15 = vadd.f32 %v839_v11, %v541_v9  ;;  %v850_v16 = vadd.f32 %v1124_v12, %v1037_v48 }
 0x301   : > { %v841_v17 = vpop.f32.mrf.mxu1 }
 0x302   : > { %875 = vst [vmem:[%s1703_s20 + $0x30] sm:$0xff] %v867_v14  ;;  %v865_v18 = vmax.f32 %v857_v15, 0.0  ;;  %v860_v19 = vadd.f32 %v850_v16, %v555_v13  ;;  %v842_v58 = vadd.f32 %v1037_v48, %v841_v17 }
 0x304   : > { %873 = vst [vmem:[%s1703_s20 + $0x20] sm:$0xff] %v865_v18  ;;  %v868_v20 = vmax.f32 %v860_v19, 0.0  ;;  %v858_v21 = vadd.f32 %v842_v58, %v545_v3 }
 0x306   : > { %876 = vst [vmem:[%s1703_s20 + $0x38] sm:$0xff] %v868_v20  ;;  %v866_v62 = vmax.f32 %v858_v21, 0.0 }
 0x308   : > { %874 = vst [vmem:[%s1703_s20 + $0x28] sm:$0xff] %v866_v62 }
 0x309   : > { %1388 = shalt.err (!%p1385_p9)
}
 0x30a   : > { %s1389_s16 = scalar_lea.hbm %s1721_s29, 1024  ;;  %s1393_s14 = scalar_lea.hbm %s1773_s7, 2048 }
 0x30b   : > { %p1390_p7 = scmp.ne.s32.totalorder %s1721_s29, %s1389_s16  ;;  %p1394_p6 = scmp.lt.s32.totalorder %s1721_s29, %s1773_s7 }
 0x30c   : > { %p1395_p11 = scmp.lt.s32.totalorder %s1393_s14, %s1389_s16 }
 0x30d   : > { %p1391_p4 = pnand %p1390_p7, %p1797_p0 }
 0x30e   : > { %p1396_p13 = por %p1395_p11, %p1394_p6 }
 0x30f   : > { %p1392_p8 = pneg %p1391_p4 }
 0x311   : > { %p1397_p12 = pnand %p1396_p13, %p1392_p8 }
 0x313   : > { %1400 = shalt.err (!%p1397_p12)
}
 0x314   : > { %s1459_s10 = smov 128   ;;  %s1460_s1 = smov 8  }
 0x315   : > { %1155 = dma.vmem_to_hbm [thread:$0]  (%p1797_p0), %s1715_s23, 1024, %s1721_s29, %s878_s15, %s1459_s10, %s1459_s10, %s1460_s1  }
 0x316 PF: > { %s906_s30 = sand.u32 1, %s1435_s24   ;;  %p1798_p5 = scmp.ne.s32.totalorder %s1782_s8, 0 }
 0x317   : > { %p1799_p10 = scmp.ge.s32.totalorder %s1447_s27, 2  ;;  %s907_s28 = scalar_lea.sflag [#allocation4], %s906_s30 }
 0x319   : > { %p1172_p1 = pnand %p1799_p10, %p1798_p5 }
 0x31b   : > { %p1173_p2 = pneg %p1172_p1 }
 0x31d   : > { %1430 = dma.done.wait (%p1173_p2), %s907_s28, 1024  }
 0x31e   : > { %1432 = vsyncadd (%p1173_p2), %s907_s28, 4294966272  ;;  %p22_p3 = scmp.ge.s32.totalorder %s1576_s13, 4   ;;  %s1800_s24 = smov %s1439_s25 }
 0x31f   : > { %s1801_s25 = smov %s1443_s26  ;;  %s1802_s26 = smov %s1597_s18 }
 0x320   : > { %s1803_s27 = smov %s1576_s13  ;;  %24 = sbr.rel (!%p22_p3) target bundleno = 9 (0x9), region = 105 }
 0x325   :  { %912 = vsyncpa [#allocation3], 1 }
 0x326   :  { %914 = vsyncpa [#allocation3 + $0x1], 1 }
 0x327   :  { %915 = vsyncpa [#allocation6], 1 }
 0x328   :  { %916 = vsyncpa [#allocation9], 1 }
 0x329   :  { %917 = vsyncpa [#allocation4], 1 }
 0x32a   :  { %919 = vsyncpa [#allocation4 + $0x1], 1 }

</bundles_post_ra>
